<compile_context>
chip_gen: v7x
topology: tpu7x:2x2x1
jax: 0.10.0
libtpu: 0.0.40
codegen_flags: <defaults>
</compile_context>

<pallas_src>
import jax
import jax.numpy as jnp
from jax.experimental import pallas as pl
from jax.experimental.pallas import tpu as pltpu

EPS = 1e-5  # nn.BatchNorm1d default eps


def encoder_sen_kernel(img_ref, wbb_ref, bbb_ref, wf_ref, bf_ref,
                       gamma_ref, beta_ref, out_ref):
    b = pl.program_id(0)
    tb = img_ref.shape[0]          # batch tile (static)
    hw = img_ref.shape[-1]         # H*W (static)
    inv_hw = 1.0 / hw

    # ---- stand-in for the pretrained ResNet-152 feature extractor ---------
    # TODO(synk): the pretrained ResNet-152 backbone cannot be reproduced
    # in-script; replaced by global-avg-pool + 1x1 projection + ReLU giving a
    # (B, C_feat) feature map with the same downstream shape semantics.
    wbb = wbb_ref[...]                                       # (3, C_feat)
    feat = bbb_ref[...]                                      # (1, C_feat) bias, broadcasts
    for c in range(3):                                       # K=3 -> VPU FMAs, skip the MXU
        xc = img_ref[:, c, :].astype(jnp.float32)            # (TB, H*W), f32 accumulation
        pc = jnp.sum(xc, axis=-1, keepdims=True) * inv_hw    # (TB, 1) lane-dense pool
        feat = feat + pc * wbb[c:c + 1, :]                   # (TB, C_feat)
    feat = jnp.maximum(feat, 0.0)

    # ---- fused senF1 + Linear (sign & biases pre-folded in the wrapper) ----
    y = jnp.dot(feat, wf_ref[...], preferred_element_type=jnp.float32)
    y = y + bf_ref[...]                                      # (TB, E)

    # Stash the pre-BN rows of this batch tile into the resident (B, E) block.
    row0 = pl.multiple_of(b * tb, tb)
    out_ref[pl.ds(row0, tb), :] = y

    # ---- nn.BatchNorm1d (training mode) over the FULL batch on last step ---
    @pl.when(b == pl.num_programs(0) - 1)
    def _():
        yy = out_ref[...]                                    # (B, E) VMEM-resident
        mu = jnp.mean(yy, axis=0, keepdims=True)
        diff = yy - mu
        var = jnp.mean(diff * diff, axis=0, keepdims=True)
        out_ref[...] = (diff * jax.lax.rsqrt(var + EPS)
                        * gamma_ref[...] + beta_ref[...])


def encoder_cnn_sen(images, params, sentiment="positive", batch_tile=None):
    B, C, H, W = images.shape
    assert C == 3
    HW = H * W
    C_feat = params["w_bb"].shape[1]
    E = params["w_lin"].shape[1]
    sign = 1.0 if sentiment == "positive" else -1.0

    # Algebraic fusion (no nonlinearity between senF1 and Linear):
    #   y = feat @ (w_sen_f @ w_lin) + ((sign*w_sen_s + b_sen) @ w_lin + b_lin)
    w_fused = (params["w_sen_f"] @ params["w_lin"]).astype(jnp.float32)
    b_fused = ((sign * params["w_sen_s"] + params["b_sen"]) @ params["w_lin"]
               + params["b_lin"]).astype(jnp.float32)

    # Lane-dense, bf16 image stream (halves HBM bytes; f32 accumulation in-kernel).
    img = images.reshape(B, C, HW).astype(jnp.bfloat16)

    if batch_tile is None:
        batch_tile = min(B, 8)     # >=8 rows of M when possible; sublane-aligned stores
    assert B % batch_tile == 0
    grid = (B // batch_tile,)

    const = lambda i: (0, 0)       # resident weights/biases: same block every step
    return pl.pallas_call(
        encoder_sen_kernel,
        out_shape=jax.ShapeDtypeStruct((B, E), jnp.float32),
        grid=grid,
        in_specs=[
            pl.BlockSpec((batch_tile, C, HW), lambda i: (i, 0, 0)),  # streamed image
            pl.BlockSpec((3, C_feat), const),
            pl.BlockSpec((1, C_feat), const),
            pl.BlockSpec((C_feat, E), const),
            pl.BlockSpec((1, E), const),
            pl.BlockSpec((1, E), const),
            pl.BlockSpec((1, E), const),
        ],
        # Full (B, E) output block, same index every step -> resident accumulator
        # across the batch grid (BatchNorm couples all rows) => "arbitrary" axis.
        out_specs=pl.BlockSpec((B, E), const),
        compiler_params=pltpu.CompilerParams(
            dimension_semantics=("arbitrary",),
            vmem_limit_bytes=32 * 1024 * 1024,  # safe on v5e/v6e/v7x (<= physical)
        ),
    )(img, params["w_bb"], params["b_bb"], w_fused, b_fused,
      params["gamma"], params["beta"])


def init_params(key, c_feat=128, embed=128):
    """Deterministic synthetic parameters (module __init__ shapes, scaled down:
    2048 -> c_feat, embed_size -> embed; senF1 is (c_feat, c_feat+1, 1, 1),
    split here into its sentiment row and feature rows)."""
    ks = jax.random.split(key, 6)
    return {
        "w_bb":    jax.random.normal(ks[0], (3, c_feat), jnp.float32) / jnp.sqrt(3.0),
        "b_bb":    jax.random.normal(ks[1], (1, c_feat), jnp.float32) * 0.1,
        "w_sen_s": jax.random.normal(ks[2], (1, c_feat), jnp.float32) / jnp.sqrt(c_feat + 1.0),
        "w_sen_f": jax.random.normal(ks[3], (c_feat, c_feat), jnp.float32) / jnp.sqrt(c_feat + 1.0),
        "b_sen":   jnp.zeros((1, c_feat), jnp.float32),
        "w_lin":   jax.random.normal(ks[4], (c_feat, embed), jnp.float32) / jnp.sqrt(1.0 * c_feat),
        "b_lin":   jax.random.normal(ks[5], (1, embed), jnp.float32) * 0.1,
        "gamma":   jnp.ones((1, embed), jnp.float32),   # BatchNorm1d weight
        "beta":    jnp.zeros((1, embed), jnp.float32),  # BatchNorm1d bias
    }


def reference(images, params, sentiment="positive"):
    """Pure-JAX reference of the same computation (un-fused formulation).
    Uses the same bf16-rounded image the kernel consumes."""
    sign = 1.0 if sentiment == "positive" else -1.0
    B = images.shape[0]
    x = images.reshape(B, 3, -1).astype(jnp.bfloat16).astype(jnp.float32)
    pooled = jnp.mean(x, axis=-1)                                       # (B, 3)
    feat = jnp.maximum(pooled @ params["w_bb"] + params["b_bb"], 0.0)   # (B, C_feat)
    z = feat @ params["w_sen_f"] + sign * params["w_sen_s"] + params["b_sen"]
    y = z @ params["w_lin"] + params["b_lin"]
    mu = jnp.mean(y, axis=0, keepdims=True)
    var = jnp.mean((y - mu) ** 2, axis=0, keepdims=True)
    return (y - mu) / jnp.sqrt(var + EPS) * params["gamma"] + params["beta"]


if __name__ == "__main__":
    key = jax.random.PRNGKey(0)
    k_img, k_par = jax.random.split(key)

    B, H, W = 16, 16, 16
    C_FEAT, EMBED = 128, 128     # lane-dense (multiples of 128); small

    images = jax.random.normal(k_img, (B, 3, H, W), jnp.float32)   # NCHW
    params = init_params(k_par, c_feat=C_FEAT, embed=EMBED)

    out = encoder_cnn_sen(images, params, sentiment="positive", batch_tile=8)
    out = jax.block_until_ready(out)

    ref = reference(images, params, sentiment="positive")
    assert out.shape == (B, EMBED), out.shape
    assert jnp.allclose(out, ref, atol=5e-3, rtol=5e-3), (
        float(jnp.max(jnp.abs(out - ref))))

    print("KERNEL_OK")
</pallas_src>

<mosaic_0001>
module attributes {stable_mosaic.version = 11 : i64} {
  func.func @encoder_sen_kernel(%arg0: i32, %arg1: memref<8x3x256xbf16, #tpu.memory_space<vmem>>, %arg2: memref<3x128xf32, #tpu.memory_space<vmem>>, %arg3: memref<1x128xf32, #tpu.memory_space<vmem>>, %arg4: memref<128x128xf32, #tpu.memory_space<vmem>>, %arg5: memref<1x128xf32, #tpu.memory_space<vmem>>, %arg6: memref<1x128xf32, #tpu.memory_space<vmem>>, %arg7: memref<1x128xf32, #tpu.memory_space<vmem>>, %arg8: memref<16x128xf32, #tpu.memory_space<vmem>>) attributes {dimension_semantics = [#tpu.dimension_semantics<arbitrary>], iteration_bounds = array<i64: 2>, scalar_prefetch = 0 : i64, scratch_operands = 0 : i64, tpu.core_type = #tpu.core_type<tc>, window_params = [{transform_indices = @transform_0, window_bounds = array<i64: 8, 3, 256>}, {pipeline_mode = #tpu.pipeline_mode<synchronous>, transform_indices = @transform_1, window_bounds = array<i64: 3, 128>}, {pipeline_mode = #tpu.pipeline_mode<synchronous>, transform_indices = @transform_2, window_bounds = array<i64: 1, 128>}, {pipeline_mode = #tpu.pipeline_mode<synchronous>, transform_indices = @transform_3, window_bounds = array<i64: 128, 128>}, {pipeline_mode = #tpu.pipeline_mode<synchronous>, transform_indices = @transform_4, window_bounds = array<i64: 1, 128>}, {pipeline_mode = #tpu.pipeline_mode<synchronous>, transform_indices = @transform_5, window_bounds = array<i64: 1, 128>}, {pipeline_mode = #tpu.pipeline_mode<synchronous>, transform_indices = @transform_6, window_bounds = array<i64: 1, 128>}, {pipeline_mode = #tpu.pipeline_mode<synchronous>, transform_indices = @transform_7, window_bounds = array<i64: 16, 128>}]} {
    %c0 = arith.constant 0 : index
    %c0_0 = arith.constant 0 : index
    %0 = vector.load %arg2[%c0, %c0_0] : memref<3x128xf32, #tpu.memory_space<vmem>>, vector<3x128xf32>
    %c0_1 = arith.constant 0 : index
    %c0_2 = arith.constant 0 : index
    %1 = vector.load %arg3[%c0_1, %c0_2] : memref<1x128xf32, #tpu.memory_space<vmem>>, vector<1x128xf32>
    %c0_3 = arith.constant 0 : index
    %c0_4 = arith.constant 0 : index
    %c0_5 = arith.constant 0 : index
    %2 = vector.load %arg1[%c0_3, %c0_4, %c0_5] : memref<8x3x256xbf16, #tpu.memory_space<vmem>>, vector<8x1x256xbf16>
    %3 = vector.shape_cast %2 : vector<8x1x256xbf16> to vector<8x256xbf16>
    %4 = arith.extf %3 : vector<8x256xbf16> to vector<8x256xf32>
    %cst = arith.constant dense<0.000000e+00> : vector<8xf32>
    %5 = vector.multi_reduction <add>, %4, %cst [1] : vector<8x256xf32> to vector<8xf32>
    %6 = vector.shape_cast %5 : vector<8xf32> to vector<8x1xf32>
    %cst_6 = arith.constant 3.906250e-03 : f32
    %7 = vector.broadcast %cst_6 : f32 to vector<8x1xf32>
    %8 = arith.mulf %6, %7 : vector<8x1xf32>
    %9 = vector.extract_strided_slice %0 {offsets = [0, 0], sizes = [1, 128], strides = [1, 1]} : vector<3x128xf32> to vector<1x128xf32>
    %10 = vector.broadcast %8 : vector<8x1xf32> to vector<8x128xf32>
    %11 = vector.broadcast %9 : vector<1x128xf32> to vector<8x128xf32>
    %12 = arith.mulf %10, %11 : vector<8x128xf32>
    %13 = vector.broadcast %1 : vector<1x128xf32> to vector<8x128xf32>
    %14 = arith.addf %13, %12 : vector<8x128xf32>
    %c0_7 = arith.constant 0 : index
    %c1 = arith.constant 1 : index
    %c0_8 = arith.constant 0 : index
    %15 = vector.load %arg1[%c0_7, %c1, %c0_8] : memref<8x3x256xbf16, #tpu.memory_space<vmem>>, vector<8x1x256xbf16>
    %16 = vector.shape_cast %15 : vector<8x1x256xbf16> to vector<8x256xbf16>
    %17 = arith.extf %16 : vector<8x256xbf16> to vector<8x256xf32>
    %cst_9 = arith.constant dense<0.000000e+00> : vector<8xf32>
    %18 = vector.multi_reduction <add>, %17, %cst_9 [1] : vector<8x256xf32> to vector<8xf32>
    %19 = vector.shape_cast %18 : vector<8xf32> to vector<8x1xf32>
    %cst_10 = arith.constant 3.906250e-03 : f32
    %20 = vector.broadcast %cst_10 : f32 to vector<8x1xf32>
    %21 = arith.mulf %19, %20 : vector<8x1xf32>
    %22 = vector.extract_strided_slice %0 {offsets = [1, 0], sizes = [1, 128], strides = [1, 1]} : vector<3x128xf32> to vector<1x128xf32>
    %23 = vector.broadcast %21 : vector<8x1xf32> to vector<8x128xf32>
    %24 = vector.broadcast %22 : vector<1x128xf32> to vector<8x128xf32>
    %25 = arith.mulf %23, %24 : vector<8x128xf32>
    %26 = arith.addf %14, %25 : vector<8x128xf32>
    %c0_11 = arith.constant 0 : index
    %c2 = arith.constant 2 : index
    %c0_12 = arith.constant 0 : index
    %27 = vector.load %arg1[%c0_11, %c2, %c0_12] : memref<8x3x256xbf16, #tpu.memory_space<vmem>>, vector<8x1x256xbf16>
    %28 = vector.shape_cast %27 : vector<8x1x256xbf16> to vector<8x256xbf16>
    %29 = arith.extf %28 : vector<8x256xbf16> to vector<8x256xf32>
    %cst_13 = arith.constant dense<0.000000e+00> : vector<8xf32>
    %30 = vector.multi_reduction <add>, %29, %cst_13 [1] : vector<8x256xf32> to vector<8xf32>
    %31 = vector.shape_cast %30 : vector<8xf32> to vector<8x1xf32>
    %cst_14 = arith.constant 3.906250e-03 : f32
    %32 = vector.broadcast %cst_14 : f32 to vector<8x1xf32>
    %33 = arith.mulf %31, %32 : vector<8x1xf32>
    %34 = vector.extract_strided_slice %0 {offsets = [2, 0], sizes = [1, 128], strides = [1, 1]} : vector<3x128xf32> to vector<1x128xf32>
    %35 = vector.broadcast %33 : vector<8x1xf32> to vector<8x128xf32>
    %36 = vector.broadcast %34 : vector<1x128xf32> to vector<8x128xf32>
    %37 = arith.mulf %35, %36 : vector<8x128xf32>
    %38 = arith.addf %26, %37 : vector<8x128xf32>
    %cst_15 = arith.constant 0.000000e+00 : f32
    %39 = vector.broadcast %cst_15 : f32 to vector<8x128xf32>
    %40 = arith.maximumf %38, %39 : vector<8x128xf32>
    %c0_16 = arith.constant 0 : index
    %c0_17 = arith.constant 0 : index
    %41 = vector.load %arg4[%c0_16, %c0_17] : memref<128x128xf32, #tpu.memory_space<vmem>>, vector<128x128xf32>
    %cst_18 = arith.constant dense<0.000000e+00> : vector<8x128xf32>
    %42 = tpu.matmul %40, %41, %cst_18 {dimension_numbers = #tpu.dot_dimension_numbers<[1], [0], [0], [1], [0, 0, 1, 1], [], []>} : vector<8x128xf32>, vector<128x128xf32>, vector<8x128xf32> -> vector<8x128xf32>
    %c0_19 = arith.constant 0 : index
    %c0_20 = arith.constant 0 : index
    %43 = vector.load %arg5[%c0_19, %c0_20] : memref<1x128xf32, #tpu.memory_space<vmem>>, vector<1x128xf32>
    %44 = vector.broadcast %43 : vector<1x128xf32> to vector<8x128xf32>
    %45 = arith.addf %42, %44 : vector<8x128xf32>
    %c8_i32 = arith.constant 8 : i32
    %46 = arith.muli %arg0, %c8_i32 : i32
    %47 = tpu.assume_multiple %46, 8 : i32
    %48 = arith.index_cast %47 : i32 to index
    %c0_21 = arith.constant 0 : index
    %49 = vector.load %arg8[%48, %c0_21] : memref<16x128xf32, #tpu.memory_space<vmem>>, vector<8x128xf32>
    tpu.vector_store %arg8[%48, %c0_21], %45 {strides = array<i32>} : memref<16x128xf32, #tpu.memory_space<vmem>>, vector<8x128xf32>,
    %c1_i32 = arith.constant 1 : i32
    %50 = arith.cmpi eq, %arg0, %c1_i32 : i32
    %51 = arith.extui %50 : i1 to i32
    %c0_i32 = arith.constant 0 : i32
    %52 = arith.cmpi ne, %51, %c0_i32 : i32
    scf.if %52 {
      %c0_22 = arith.constant 0 : index
      %c0_23 = arith.constant 0 : index
      %53 = vector.load %arg8[%c0_22, %c0_23] : memref<16x128xf32, #tpu.memory_space<vmem>>, vector<16x128xf32>
      %cst_24 = arith.constant dense<0.000000e+00> : vector<128xf32>
      %54 = vector.multi_reduction <add>, %53, %cst_24 [0] : vector<16x128xf32> to vector<128xf32>
      %55 = vector.shape_cast %54 : vector<128xf32> to vector<1x128xf32>
      %cst_25 = arith.constant 1.600000e+01 : f32
      %56 = vector.broadcast %cst_25 : f32 to vector<1x128xf32>
      %57 = arith.divf %55, %56 : vector<1x128xf32>
      %58 = vector.broadcast %57 : vector<1x128xf32> to vector<16x128xf32>
      %59 = arith.subf %53, %58 : vector<16x128xf32>
      %60 = arith.mulf %59, %59 : vector<16x128xf32>
      %cst_26 = arith.constant dense<0.000000e+00> : vector<128xf32>
      %61 = vector.multi_reduction <add>, %60, %cst_26 [0] : vector<16x128xf32> to vector<128xf32>
      %62 = vector.shape_cast %61 : vector<128xf32> to vector<1x128xf32>
      %cst_27 = arith.constant 1.600000e+01 : f32
      %63 = vector.broadcast %cst_27 : f32 to vector<1x128xf32>
      %64 = arith.divf %62, %63 : vector<1x128xf32>
      %cst_28 = arith.constant 9.99999974E-6 : f32
      %65 = vector.broadcast %cst_28 : f32 to vector<1x128xf32>
      %66 = arith.addf %64, %65 : vector<1x128xf32>
      %67 = math.rsqrt %66 : vector<1x128xf32>
      %68 = vector.broadcast %67 : vector<1x128xf32> to vector<16x128xf32>
      %69 = arith.mulf %59, %68 : vector<16x128xf32>
      %c0_29 = arith.constant 0 : index
      %c0_30 = arith.constant 0 : index
      %70 = vector.load %arg6[%c0_29, %c0_30] : memref<1x128xf32, #tpu.memory_space<vmem>>, vector<1x128xf32>
      %71 = vector.broadcast %70 : vector<1x128xf32> to vector<16x128xf32>
      %72 = arith.mulf %69, %71 : vector<16x128xf32>
      %c0_31 = arith.constant 0 : index
      %c0_32 = arith.constant 0 : index
      %73 = vector.load %arg7[%c0_31, %c0_32] : memref<1x128xf32, #tpu.memory_space<vmem>>, vector<1x128xf32>
      %74 = vector.broadcast %73 : vector<1x128xf32> to vector<16x128xf32>
      %75 = arith.addf %72, %74 : vector<16x128xf32>
      %c0_33 = arith.constant 0 : index
      %c0_34 = arith.constant 0 : index
      %76 = vector.load %arg8[%c0_33, %c0_34] : memref<16x128xf32, #tpu.memory_space<vmem>>, vector<16x128xf32>
      tpu.vector_store %arg8[%c0_33, %c0_34], %75 {strides = array<i32>} : memref<16x128xf32, #tpu.memory_space<vmem>>, vector<16x128xf32>,
    } else {
    }
    return
  }
  func.func @transform_0(%arg0: i32) -> (i32, i32, i32) {
    %c0_i32 = arith.constant 0 : i32
    %c0_i32_0 = arith.constant 0 : i32
    %c0_i32_1 = arith.constant 0 : i32
    return %arg0, %c0_i32, %c0_i32_0 : i32, i32, i32
  }
  func.func @transform_1(%arg0: i32) -> (i32, i32) {
    %c0_i32 = arith.constant 0 : i32
    %c0_i32_0 = arith.constant 0 : i32
    %c0_i32_1 = arith.constant 0 : i32
    return %c0_i32, %c0_i32_0 : i32, i32
  }
  func.func @transform_2(%arg0: i32) -> (i32, i32) {
    %c0_i32 = arith.constant 0 : i32
    %c0_i32_0 = arith.constant 0 : i32
    %c0_i32_1 = arith.constant 0 : i32
    return %c0_i32, %c0_i32_0 : i32, i32
  }
  func.func @transform_3(%arg0: i32) -> (i32, i32) {
    %c0_i32 = arith.constant 0 : i32
    %c0_i32_0 = arith.constant 0 : i32
    %c0_i32_1 = arith.constant 0 : i32
    return %c0_i32, %c0_i32_0 : i32, i32
  }
  func.func @transform_4(%arg0: i32) -> (i32, i32) {
    %c0_i32 = arith.constant 0 : i32
    %c0_i32_0 = arith.constant 0 : i32
    %c0_i32_1 = arith.constant 0 : i32
    return %c0_i32, %c0_i32_0 : i32, i32
  }
  func.func @transform_5(%arg0: i32) -> (i32, i32) {
    %c0_i32 = arith.constant 0 : i32
    %c0_i32_0 = arith.constant 0 : i32
    %c0_i32_1 = arith.constant 0 : i32
    return %c0_i32, %c0_i32_0 : i32, i32
  }
  func.func @transform_6(%arg0: i32) -> (i32, i32) {
    %c0_i32 = arith.constant 0 : i32
    %c0_i32_0 = arith.constant 0 : i32
    %c0_i32_1 = arith.constant 0 : i32
    return %c0_i32, %c0_i32_0 : i32, i32
  }
  func.func @transform_7(%arg0: i32) -> (i32, i32) {
    %c0_i32 = arith.constant 0 : i32
    %c0_i32_0 = arith.constant 0 : i32
    %c0_i32_1 = arith.constant 0 : i32
    return %c0_i32, %c0_i32_0 : i32, i32
  }
}

</mosaic_0001>

<bundles_post_ra>
// kernel: tpu_custom_call.1
= control target key start
LH: loop header
LB: loop body
LE: loop exit
PB: predicated region body
PF: predicated region fallthrough
CT: control target
= control target key end

     0   :  { %12 = vsyncpa [#allocation3], 0  ;;  %s1391_s0 = inlined_call_operand.vmem [shape: bf16[16,3,256], index: 0, kind: input, shape index: {}]   ;;  %s1392_s1 = inlined_call_operand.vmem [shape: f32[3,128], index: 1, kind: input, shape index: {}]   ;;  %s1393_s2 = inlined_call_operand.vmem [shape: f32[1,128], index: 2, kind: input, shape index: {}]   ;;  %s1394_s3 = inlined_call_operand.hbm [shape: f32[128,128], index: 3, kind: input, shape index: {}]   ;;  %s1395_s4 = inlined_call_operand.vmem [shape: f32[1,128], index: 4, kind: input, shape index: {}]   ;;  %s1396_s5 = inlined_call_operand.vmem [shape: f32[1,128], index: 5, kind: input, shape index: {}]   ;;  %s1397_s6 = inlined_call_operand.vmem [shape: f32[1,128], index: 6, kind: input, shape index: {}]   ;;  %s1398_s7 = inlined_call_operand.hbm [shape: f32[16,128], index: 7, kind: output, shape index: {}]  }
   0x1   :  { %13 = vsyncpa [#allocation4], 0  ;;  %s1114_s24 = smov 0  }
   0x2 LB: > { %s1120_s25 = sadd.s32 4294967295, %s1063_s24   ;;  %p865_p0 = scmp.ge.s32.totalorder %s1063_s24, 1  ;;  %s1063_s24 = sphi %s1114_s24, %s19_s24  }
   0x3   : > { %p197_p1 = scmp.lt.s32.totalorder %s1063_s24, 3  ;;  %s1065_s26 = smov [#allocation2]  }
   0x4   : > { %s215_s27 = sshll.u32 %s1065_s26, 4  ;;  %p1399_p3 = scmp.eq.s32.totalorder %s1120_s25, 0  ;;  %s216_s27 = int_to_ptr.vmem [resolvable:$true] %s215_s27 }
   0x5   : > { %p1124_p2 = pnand %p865_p0, %p197_p1  ;;  %s995_s9 = scalar_lea.hbm %s1394_s3, 2048 }
   0x6   : > { %p996_p6 = scmp.ne.s32.totalorder %s1394_s3, %s995_s9  ;;  %p1002_p10 = scmp.lt.u32.totalorder %s995_s9, %s1394_s3 }
   0x7   : > { %s1401_s28 = scalar_select %p1124_p2, 1, 0 }
   0x8   : > { %p968_p4 = pneg %p1124_p2 }
   0xa   : > { %p1133_p5 = pnand %p1399_p3, %p968_p4 }
   0xc   : > { %p997_p7 = pneg %p1133_p5 }
   0xe   : > { %p998_p8 = pnand %p997_p7, %p996_p6 }
  0x10   : > { %p999_p9 = pneg %p998_p8 }
  0x12   : > { %p1004_p11 = pnand %p1002_p10, %p999_p9 }
  0x14   : > { %1007 = shalt.err (!%p1004_p11)
}
  0x15   : > { %s1008_s14 = scalar_lea.vmem %s216_s27, 2048  ;;  %p1016_p1 = scmp.lt.s32.totalorder %s216_s27, %s216_s27 }
  0x16   : > { %p1009_p12 = scmp.ne.s32.totalorder %s216_s27, %s1008_s14  ;;  %p1017_p4 = scmp.lt.s32.totalorder %s1008_s14, %s1008_s14 }
  0x18   : > { %p1011_p13 = pnand %p1009_p12, %p997_p7  ;;  %p1018_p3 = por %p1017_p4, %p1016_p1 }
  0x1a   : > { %p1012_p0 = pneg %p1011_p13 }
  0x1c   : > { %p1019_p2 = pnand %p1018_p3, %p1012_p0 }
  0x1e   : > { %1022 = shalt.err (!%p1019_p2)
}
  0x1f   : > { %s1066_s15 = smov 128   ;;  %s1067_s16 = smov 8  }
  0x20   : > { %971 = dma.hbm_to_vmem [thread:$0]  (!%p1133_p5), %s1394_s3, 2048, %s216_s27, [#allocation3], %s1066_s15, %s1066_s15, %s1067_s16  }
  0x21   : > { %p1403_p6 = scmp.ne.s32.totalorder %s1401_s28, 0 }
  0x22   : > { %p1404_p8 = scmp.eq.s32.totalorder (!%p1403_p6), %s1120_s25, 0 }
  0x23   : > { %250 = sbr.rel (%p1403_p6) target bundleno = 542 (0x21e), region = 48 }
  0x2a   : > { %1054 = dma.done.wait (%p1404_p8), [#allocation3], 2048   ;;  %p1405_p7 = pmov %p1404_p8 }
  0x2b   : > { %s1160_s19 = sshll.u32 %s1120_s25, 3  ;;  %v311_v0 = vlaneseq  ;;  %v1068_v2 = vmov 0.0|0.0   ;;  %vm500_vm0 = vcmask 1040384   ;;  %vm377_vm1 = vcmask 1042434   ;;  %p876_p3 = scmp.ne.s32.totalorder %s1120_s25, 1 }
  0x2c   : > { %1056 = vsyncadd (%p1405_p7), [#allocation3], 4294965248  ;;  %p279_p2 = scmp.lt.s32.totalorder %s1160_s19, 15  ;;  %936 = vmatprep.subr.bf16.mxu0 %v1068_v2  ;;  %vm379_vm2 = vcmask 1043459   ;;  %vm381_vm3 = vcmask 1044484   ;;  %vm383_vm4 = vcmask 1045509  }
  0x2d   : > { %v312_v1 = vshrl.u32 %v311_v0, 7  ;;  %vm385_vm5 = vcmask 1046534   ;;  %vm387_vm6 = vcmask 1047559   ;;  %vm494_vm7 = vcmask 1047553   ;;  %s749_s10 = scalar_lea.vmem [#allocation5], %s1160_s19 }
  0x2e   : > { %s280_s20 = scalar_select %p279_p2, %s1160_s19, 15  ;;  %vm375_vm8 = vcmask 1041409   ;;  %vm632_vm9 = vcmask 1041408   ;;  %vm626_vm10 = vcmask 1047554   ;;  %vm1069_vm11 = vmmov 0  }
  0x2f   : > { %v1165_v3 = vsub.s32 1, %v312_v1  ;;  %v1172_v4 = vsub.s32 5, %v312_v1  ;;  %v1174_v5 = vsub.s32 0, %v312_v1  ;;  %v1176_v6 = vsub.s32 4, %v312_v1 }
  0x30   : > { %s883_s21 = sshll.u32 %s280_s20, 2  ;;  %v1178_v7 = vsub.s32 2, %v312_v1  ;;  %v1200_v22 = vsub.s32 6, %v312_v1  ;;  %vm516_vm12 = vcmask 1046528   ;;  %vm648_vm13 = vcmask 1045504  }
  0x31   : > { %s1170_s26 = scalar_lea.vmem %s1391_s0, %s883_s21 }
  0x32   : > { %v294_v8 = vld [vmem:[%s1170_s26 + $0x1c] sm:$0x5]  ;;  %v287_v9 = vld [vmem:[%s1170_s26] sm:$0x5]  ;;  %v288_v10 = vld [vmem:[%s1170_s26 + $0x4] sm:$0x5] }
  0x33   : > { %v1183_v11 = vunpack.c.l.bf16 %v294_v8  ;;  %v289_v12 = vld [vmem:[%s1170_s26 + $0x8] sm:$0x5]  ;;  %v290_v13 = vld [vmem:[%s1170_s26 + $0xc] sm:$0x5]  ;;  %v291_v14 = vld [vmem:[%s1170_s26 + $0x10] sm:$0x5]  ;;  %v1188_v15 = vunpack.c.l.bf16 %v287_v9  ;;  %v1190_v16 = vunpack.c.l.bf16 %v288_v10 }
  0x34   : > { %v292_v17 = vld [vmem:[%s1170_s26 + $0x14] sm:$0x5]  ;;  %v293_v18 = vld [vmem:[%s1170_s26 + $0x18] sm:$0x5]  ;;  %v1194_v19 = vunpack.c.l.bf16 %v289_v12  ;;  %v1196_v20 = vunpack.c.l.bf16 %v290_v13  ;;  %v1198_v21 = vunpack.c.l.bf16 %v291_v14  ;;  %v528_v8 = vld [vmem:[%s1170_s26 + $0x18] sm:$0xa] }
  0x35   : > { %v473_v23 = vrot.slane %v1183_v11, %v1165_v3  ;;  %v477_v24 = vrot.slane %v1183_v11, %v1172_v4  ;;  %v1206_v25 = vunpack.c.l.bf16 %v292_v17  ;;  %v1208_v26 = vunpack.c.l.bf16 %v293_v18  ;;  %v529_v9 = vld [vmem:[%s1170_s26 + $0x1c] sm:$0xa] }
  0x36   : > { %v417_v27 = vrot.slane %v1188_v15, %v1165_v3  ;;  %v421_v28 = vrot.slane %v1188_v15, %v1172_v4  ;;  %v425_v29 = vrot.slane %v1190_v16, %v1165_v3  ;;  %v429_v30 = vrot.slane %v1190_v16, %v1172_v4 }
  0x37   : > { %v501_v31 = vsel %vm500_vm0, %v473_v23, 0.0  ;;  %v502_v32 = vsel %vm500_vm0, %v477_v24, 0.0  ;;  %v433_v33 = vrot.slane %v1194_v19, %v1165_v3  ;;  %v437_v34 = vrot.slane %v1194_v19, %v1172_v4 }
  0x38   : > { %v503_v35 = vadd.f32 %v502_v32, %v501_v31  ;;  %v441_v36 = vrot.slane %v1196_v20, %v1165_v3  ;;  %v445_v37 = vrot.slane %v1196_v20, %v1172_v4  ;;  %v449_v38 = vrot.slane %v1198_v21, %v1165_v3 }
  0x39   : > { %v453_v39 = vrot.slane %v1198_v21, %v1172_v4  ;;  %v457_v40 = vrot.slane %v1206_v25, %v1165_v3  ;;  %v461_v41 = vrot.slane %v1206_v25, %v1172_v4  ;;  %v465_v42 = vrot.slane %v1208_v26, %v1165_v3 }
  0x3a   : > { %504 = vadd.xlane.f32.xlu0 %v503_v35  ;;  %v469_v43 = vrot.slane %v1208_v26, %v1172_v4  ;;  %v478_v44 = vsel %vm377_vm1, %v425_v29, %v417_v27  ;;  %v484_v45 = vsel %vm377_vm1, %v429_v30, %v421_v28  ;;  %v314_v46 = vrot.slane %v1188_v15, %v1174_v5  ;;  %v525_v29 = vld [vmem:[%s1170_s26 + $0xc] sm:$0xa] }
  0x3b   : > { %v479_v47 = vsel %vm379_vm2, %v433_v33, %v478_v44  ;;  %v485_v48 = vsel %vm379_vm2, %v437_v34, %v484_v45  ;;  %v318_v49 = vrot.slane %v1188_v15, %v1176_v6  ;;  %v322_v50 = vrot.slane %v1190_v16, %v1174_v5  ;;  %v522_v15 = vld [vmem:[%s1170_s26] sm:$0xa] }
  0x3c   : > { %v480_v51 = vsel %vm381_vm3, %v441_v36, %v479_v47  ;;  %v486_v52 = vsel %vm381_vm3, %v445_v37, %v485_v48  ;;  %v326_v53 = vrot.slane %v1190_v16, %v1176_v6  ;;  %v330_v54 = vrot.slane %v1194_v19, %v1174_v5  ;;  %v523_v16 = vld [vmem:[%s1170_s26 + $0x4] sm:$0xa] }
  0x3d   : > { %v481_v55 = vsel %vm383_vm4, %v449_v38, %v480_v51  ;;  %v487_v56 = vsel %vm383_vm4, %v453_v39, %v486_v52  ;;  %v334_v57 = vrot.slane %v1194_v19, %v1176_v6  ;;  %v338_v58 = vrot.slane %v1196_v20, %v1174_v5 }
  0x3e   : > { %v482_v59 = vsel %vm385_vm5, %v457_v40, %v481_v55  ;;  %v488_v60 = vsel %vm385_vm5, %v461_v41, %v487_v56  ;;  %v342_v61 = vrot.slane %v1196_v20, %v1176_v6  ;;  %v346_v62 = vrot.slane %v1198_v21, %v1174_v5  ;;  %v526_v40 = vld [vmem:[%s1170_s26 + $0x10] sm:$0xa]  ;;  %v527_v41 = vld [vmem:[%s1170_s26 + $0x14] sm:$0xa] }
  0x3f   : > { %v483_v63 = vsel %vm387_vm6, %v465_v42, %v482_v59  ;;  %v489_v0 = vsel %vm387_vm6, %v469_v43, %v488_v60  ;;  %v350_v1 = vrot.slane %v1198_v21, %v1176_v6  ;;  %v354_v4 = vrot.slane %v1206_v25, %v1174_v5  ;;  %v655_v60 = vld [vmem:[#allocation2] sm:$0xff] }
  0x40   : > { %v495_v10 = vsel %vm494_vm7, %v483_v63, 0.0  ;;  %v496_v12 = vsel %vm494_vm7, %v489_v0, 0.0  ;;  %v358_v13 = vrot.slane %v1206_v25, %v1176_v6  ;;  %v362_v14 = vrot.slane %v1208_v26, %v1174_v5 }
  0x41   : > { %v497_v17 = vadd.f32 %v496_v12, %v495_v10  ;;  %v366_v18 = vrot.slane %v1208_v26, %v1176_v6  ;;  %v370_v19 = vrot.slane %v1183_v11, %v1174_v5  ;;  %v374_v20 = vrot.slane %v1183_v11, %v1176_v6  ;;  %v524_v26 = vld [vmem:[%s1170_s26 + $0x8] sm:$0xa]  ;;  %v657_v10 = vld [vmem:[#allocation2 + $0x10] sm:$0xff]  ;;  %v658_v12 = vld [vmem:[#allocation2 + $0x18] sm:$0xff] }
  0x42   : > { %v376_v21 = vsel %vm375_vm8, %v322_v50, %v314_v46  ;;  %v389_v23 = vsel %vm375_vm8, %v326_v53, %v318_v49  ;;  %v536_v24 = vunpack.c.l.bf16 %v528_v8  ;;  %v537_v25 = vunpack.c.l.bf16 %v529_v9 }
  0x43   : > { %498 = vadd.xlane.f32.xlu0 %v497_v17  ;;  %v378_v27 = vsel %vm377_vm1, %v330_v54, %v376_v21  ;;  %v390_v28 = vsel %vm377_vm1, %v334_v57, %v389_v23  ;;  %v530_v30 = vunpack.c.l.bf16 %v522_v15  ;;  %v531_v31 = vunpack.c.l.bf16 %v523_v16 }
  0x44   : > { %v380_v32 = vsel %vm379_vm2, %v338_v58, %v378_v27  ;;  %v391_v6 = vsel %vm379_vm2, %v342_v61, %v390_v28  ;;  %v597_v11 = vrot.slane %v536_v24, %v1178_v7  ;;  %v601_v33 = vrot.slane %v536_v24, %v1200_v22  ;;  %v656_v61 = vld [vmem:[#allocation2 + $0x8] sm:$0xff]  ;;  %v659_v24 = vld [vmem:[#allocation2 + $0x20] sm:$0xff] }
  0x45   : > { %v382_v34 = vsel %vm381_vm3, %v346_v62, %v380_v32  ;;  %v392_v35 = vsel %vm381_vm3, %v350_v1, %v391_v6  ;;  %v605_v36 = vrot.slane %v537_v25, %v1178_v7  ;;  %v609_v37 = vrot.slane %v537_v25, %v1200_v22  ;;  %v660_v25 = vld [vmem:[#allocation2 + $0x28] sm:$0xff]  ;;  %v661_v32 = vld [vmem:[#allocation2 + $0x30] sm:$0xff]  ;;  %v662_v6 = vld [vmem:[#allocation2 + $0x38] sm:$0xff] }
  0x46   : > { %v384_v38 = vsel %vm383_vm4, %v354_v4, %v382_v34  ;;  %v393_v39 = vsel %vm383_vm4, %v358_v13, %v392_v35  ;;  %v532_v42 = vunpack.c.l.bf16 %v524_v26  ;;  %v533_v43 = vunpack.c.l.bf16 %v525_v29  ;;  %v664_v34 = vld [vmem:[#allocation2 + $0x48] sm:$0xff] }
  0x47   : > { %v386_v44 = vsel %vm385_vm5, %v362_v14, %v384_v38  ;;  %v394_v45 = vsel %vm385_vm5, %v366_v18, %v393_v39  ;;  %v620_v46 = vsel %vm375_vm8, %v605_v36, %v597_v11  ;;  %v621_v47 = vsel %vm375_vm8, %v609_v37, %v601_v33  ;;  %v663_v33 = vld [vmem:[#allocation2 + $0x40] sm:$0xff]  ;;  %v665_v36 = vld [vmem:[#allocation2 + $0x50] sm:$0xff]  ;;  %v666_v37 = vld [vmem:[#allocation2 + $0x58] sm:$0xff] }
  0x48   : > { %v388_v48 = vsel %vm387_vm6, %v370_v19, %v386_v44  ;;  %v395_v49 = vsel %vm387_vm6, %v374_v20, %v394_v45  ;;  %v633_v50 = vsel %vm632_vm9, %v620_v46, 0.0  ;;  %v634_v51 = vsel %vm632_vm9, %v621_v47, 0.0  ;;  %v667_v39 = vld [vmem:[#allocation2 + $0x60] sm:$0xff] }
  0x49   : > { %v398_v52 = vadd.f32 %v395_v49, %v388_v48  ;;  %v635_v53 = vadd.f32 %v634_v51, %v633_v50  ;;  %v534_v54 = vunpack.c.l.bf16 %v526_v40  ;;  %v535_v55 = vunpack.c.l.bf16 %v527_v41  ;;  %v668_v40 = vld [vmem:[#allocation2 + $0x68] sm:$0xff]  ;;  %v285_v47 = vld [vmem:[%s1392_s1] sm:$0x7] }
  0x4a   : > { %v549_v56 = vrot.slane %v530_v30, %v1178_v7  ;;  %v553_v57 = vrot.slane %v530_v30, %v1200_v22  ;;  %v557_v58 = vrot.slane %v531_v31, %v1178_v7  ;;  %v561_v59 = vrot.slane %v531_v31, %v1200_v22 }
  0x4b   : > { %399 = vadd.xlane.f32.xlu1 %v398_v52  ;;  %636 = vadd.xlane.f32.xlu0 %v635_v53  ;;  %v565_v62 = vrot.slane %v532_v42, %v1178_v7  ;;  %v569_v63 = vrot.slane %v532_v42, %v1200_v22  ;;  %v573_v0 = vrot.slane %v533_v43, %v1178_v7  ;;  %v669_v42 = vld [vmem:[#allocation2 + $0x70] sm:$0xff]  ;;  %v1070_v45 = vmov 0.0  }
  0x4c   : > { %v577_v1 = vrot.slane %v533_v43, %v1200_v22  ;;  %v581_v4 = vrot.slane %v534_v54, %v1178_v7  ;;  %v585_v8 = vrot.slane %v534_v54, %v1200_v22  ;;  %v589_v9 = vrot.slane %v535_v55, %v1178_v7  ;;  %v670_v43 = vld [vmem:[#allocation2 + $0x78] sm:$0xff]  ;;  %933 = vmatprep.mubr.msk.f32.mxu0 %vm1069_vm11, %v1070_v45 }
  0x4d   : > { %v593_v13 = vrot.slane %v535_v55, %v1200_v22  ;;  %v610_v14 = vsel %vm379_vm2, %v557_v58, %v549_v56  ;;  %v615_v15 = vsel %vm379_vm2, %v561_v59, %v553_v57  ;;  %v937_v16 = vpack.c.bf16 %v656_v61, %v655_v60  ;;  %v873_v58 = vld [vmem:[%s1393_s2] ss:$0 sm:$0xff] }
  0x4e   : > { %v611_v17 = vsel %vm381_vm3, %v565_v62, %v610_v14  ;;  %v616_v18 = vsel %vm381_vm3, %v569_v63, %v615_v15  ;;  %v940_v21 = vpack.c.bf16 %v658_v12, %v657_v10  ;;  %v943_v31 = vpack.c.bf16 %v660_v25, %v659_v24  ;;  %v874_v15 = vld [vmem:[%s1395_s4] ss:$0 sm:$0xff] }
  0x4f   : > { %v612_v19 = vsel %vm383_vm4, %v573_v0, %v611_v17  ;;  %v617_v20 = vsel %vm383_vm4, %v577_v1, %v616_v18  ;;  %938 = vmatpush3.bf16.msra.mxu0 %v937_v16  ;;  %v946_v11 = vpack.c.bf16 %v662_v6, %v661_v32  ;;  %v949_v35 = vpack.c.bf16 %v664_v34, %v663_v33 }
  0x50   : > { %v613_v23 = vsel %vm385_vm5, %v581_v4, %v612_v19  ;;  %v618_v22 = vsel %vm385_vm5, %v585_v8, %v617_v20  ;;  %939 = vmatprep.subr.bf16.mxu0 %v1068_v2  ;;  %v952_v38 = vpack.c.bf16 %v666_v37, %v665_v36  ;;  %v955_v41 = vpack.c.bf16 %v668_v40, %v667_v39  ;;  %v877_v40 = vld [vmem:[%s1396_s5] ss:$0 sm:$0xff] (!%p876_p3) }
  0x51   : > { %v614_v27 = vsel %vm387_vm6, %v589_v9, %v613_v23  ;;  %v619_v28 = vsel %vm387_vm6, %v593_v13, %v618_v22  ;;  %v958_v44 = vpack.c.bf16 %v670_v43, %v669_v42  ;;  %v511_v51 = vrot.slane %v285_v47, %v1165_v3  ;;  %v878_v43 = vld [vmem:[%s1397_s6] ss:$0 sm:$0xff] (!%p876_p3) }
  0x52   : > { %v627_v26 = vsel %vm626_vm10, %v614_v27, 0.0  ;;  %v628_v29 = vsel %vm626_vm10, %v619_v28, 0.0  ;;  %v405_v54 = vrot.slane %v285_v47, %v1174_v5  ;;  %v643_v3 = vrot.slane %v285_v47, %v1178_v7 }
  0x53   : > { %v629_v30 = vadd.f32 %v628_v29, %v627_v26  ;;  %941 = vmatpush3.bf16.msra.mxu0 %v940_v21 }
  0x54   : > { %942 = vmatprep.subr.bf16.mxu0 %v1068_v2 }
  0x55   : > { %630 = vadd.xlane.f32.xlu1 %v629_v30 }
  0x57   : > { %944 = vmatpush3.bf16.msra.mxu0 %v943_v31 }
  0x58   : > { %945 = vmatprep.subr.bf16.mxu0 %v1068_v2 }
  0x5b   : > { %947 = vmatpush3.bf16.msra.mxu0 %v946_v11 }
  0x5c   : > { %948 = vmatprep.subr.bf16.mxu0 %v1068_v2 }
  0x5f   : > { %950 = vmatpush3.bf16.msra.mxu0 %v949_v35 }
  0x60   : > { %951 = vmatprep.subr.bf16.mxu0 %v1068_v2 }
  0x63   : > { %953 = vmatpush3.bf16.msra.mxu0 %v952_v38 }
  0x64   : > { %954 = vmatprep.subr.bf16.mxu0 %v1068_v2 }
  0x67   : > { %956 = vmatpush3.bf16.msra.mxu0 %v955_v41 }
  0x68   : > { %957 = vmatprep.subr.bf16.mxu0 %v1068_v2 }
  0x6b   : > { %959 = vmatpush3.bf16.msra.mxu0 %v958_v44 }
  0xc7   : > { %v505_v46 = vpop.xlane.xlu0 %504 }
  0xc8   : > { %v507_v50 = vmul.f32 0.00390625, %v505_v46 }
  0xca   : > { %v513_v53 = vmul.f32 %v511_v51, %v507_v50 }
  0xcc   : > { %v518_v57 = vrot.slane %v513_v53, 1 }
  0xd0   : > { %v499_v48 = vpop.xlane.xlu0 %498 }
  0xd1   : > { %v506_v49 = vmul.f32 0.00390625, %v499_v48 }
  0xd3   : > { %v512_v52 = vmul.f32 %v511_v51, %v506_v49 }
  0xd5   : > { %v517_v2 = vrot.slane %v512_v52, 1 }
  0xd7   : > { %v519_v61 = vsel %vm516_vm12, %v517_v2, %v518_v57 }
  0xd8   : > { %v400_v55 = vpop.xlane.xlu1 %399  ;;  %v637_v59 = vpop.xlane.xlu0 %636 }
  0xd9   : > { %v401_v56 = vmul.f32 0.00390625, %v400_v55  ;;  %v639_v63 = vmul.f32 0.00390625, %v637_v59 }
  0xdb   : > { %v406_v60 = vmul.f32 %v405_v54, %v401_v56  ;;  %v645_v1 = vmul.f32 %v643_v3, %v639_v63 }
  0xdd   : > { %v413_v62 = vadd.f32 %v873_v58, %v406_v60  ;;  %v650_v8 = vrot.slane %v645_v1, 2 }
  0xdf   : > { %v521_v0 = vadd.f32 %v519_v61, %v413_v62 }
  0xe2   : > { %v631_v5 = vpop.xlane.xlu1 %630 }
  0xe3   : > { %v638_v4 = vmul.f32 0.00390625, %v631_v5 }
  0xe5   : > { %v644_v9 = vmul.f32 %v643_v3, %v638_v4 }
  0xe7   : > { %v649_v10 = vrot.slane %v644_v9, 2 }
  0xe9   : > { %v651_v12 = vsel %vm648_vm13, %v649_v10, %v650_v8 }
  0xea   : > { %v653_v13 = vadd.f32 %v651_v12, %v521_v0 }
  0xec   : > { %v654_v14 = vmax.f32 %v653_v13, 0.0 }
  0xee   : > { %934 = vmatmul.mubr.f32.vlgmr.msra.gmra.mrb[0].mxu0 %v654_v14 }
 0x1be   : > { %754 = sbr.rel (%p876_p3) target bundleno = 516 (0x204), region = 56 }
 0x1c1   : > { %v744_v16 = vpop.f32.mrb[0].mxu0 }
 0x1c2   : > { %v745_v17 = vadd.f32 %v874_v15, %v744_v16  ;;  %v935_v7 = vpop.f32.mrb[1].mxu0 }
 0x1c4   : > { %750 = vst [vmem:[%s749_s10] sm:$0xff] %v745_v17 }
 0x1cb   : > { %v755_v18 = vld [vmem:[#allocation5] sm:$0xff]  ;;  %v756_v19 = vld [vmem:[#allocation5 + $0x8] sm:$0xff] }
 0x1cc   : > { %v757_v20 = vadd.f32 %v756_v19, %v755_v18 }
 0x1ce   : > { %v758_v21 = vrot.slane %v757_v20, 4 }
 0x1d0   : > { %v759_v23 = vadd.f32 %v758_v21, %v757_v20 }
 0x1d2   : > { %v760_v22 = vrot.slane %v759_v23, 2 }
 0x1d4   : > { %v761_v24 = vadd.f32 %v760_v22, %v759_v23 }
 0x1d6   : > { %v762_v25 = vrot.slane %v761_v24, 1 }
 0x1d8   : > { %v763_v27 = vadd.f32 %v762_v25, %v761_v24 }
 0x1da   : > { %v765_v28 = vmul.f32 0.0625, %v763_v27 }
 0x1dc   : > { %v766_v26 = vsub.f32 %v755_v18, %v765_v28  ;;  %v767_v29 = vsub.f32 %v756_v19, %v765_v28 }
 0x1de   : > { %v768_v30 = vmul.f32 %v766_v26, %v766_v26  ;;  %v769_v31 = vmul.f32 %v767_v29, %v767_v29 }
 0x1e0   : > { %v770_v32 = vadd.f32 %v769_v31, %v768_v30 }
 0x1e2   : > { %v771_v6 = vrot.slane %v770_v32, 4 }
 0x1e4   : > { %v772_v11 = vadd.f32 %v771_v6, %v770_v32 }
 0x1e6   : > { %v773_v33 = vrot.slane %v772_v11, 2 }
 0x1e8   : > { %v774_v34 = vadd.f32 %v773_v33, %v772_v11 }
 0x1ea   : > { %v775_v35 = vrot.slane %v774_v34, 1 }
 0x1ec   : > { %v776_v36 = vadd.f32 %v775_v35, %v774_v34 }
 0x1ee   : > { %v777_v37 = vmul.f32 0.0625, %v776_v36 }
 0x1f0   : > { %v778_v38 = vadd.f32 1e-05, %v777_v37 }
 0x1f2   : > { %993 = vrsqrt.f32 %v778_v38 }
 0x1fc   : > { %v994_v39 = vpop.eup %993 }
 0x1fd   : > { %v780_v41 = vmul.f32 %v994_v39, %v766_v26  ;;  %v781_v42 = vmul.f32 %v994_v39, %v767_v29 }
 0x1ff   : > { %v789_v44 = vmul.f32 %v877_v40, %v780_v41  ;;  %v790_v45 = vmul.f32 %v877_v40, %v781_v42 }
 0x201   : > { %v798_v46 = vadd.f32 %v878_v43, %v789_v44  ;;  %v799_v47 = vadd.f32 %v878_v43, %v790_v45 }
 0x203   : > { %800 = vst [vmem:[#allocation5] sm:$0xff] %v798_v46  ;;  %801 = vst [vmem:[#allocation5 + $0x8] sm:$0xff] %v799_v47 }
 0x204 PF: > { %p974_p5 = scmp.eq.s32.totalorder %s1120_s25, 1  ;;  %s1071_s15 = smov [#allocation5]  }
 0x205   : > { %s808_s16 = sshll.u32 %s1071_s15, 4  ;;  %s809_s16 = int_to_ptr.vmem [resolvable:$true] %s808_s16 }
 0x206   : > { %s1023_s17 = scalar_lea.vmem %s809_s16, 256  ;;  %p1030_p12 = scmp.lt.s32.totalorder %s809_s16, %s809_s16 }
 0x207   : > { %p1024_p9 = scmp.ne.s32.totalorder %s809_s16, %s1023_s17  ;;  %p1031_p13 = scmp.lt.s32.totalorder %s1023_s17, %s1023_s17 }
 0x209   : > { %p1025_p10 = pnand %p1024_p9, %p974_p5  ;;  %p1032_p0 = por %p1031_p13, %p1030_p12 }
 0x20b   : > { %p1026_p11 = pneg %p1025_p10 }
 0x20d   : > { %p1033_p1 = pnand %p1032_p0, %p1026_p11 }
 0x20f   : > { %1036 = shalt.err (!%p1033_p1)
}
 0x210   : > { %s1037_s20 = scalar_lea.hbm %s1398_s7, 256 }
 0x211   : > { %p1038_p4 = scmp.ne.s32.totalorder %s1398_s7, %s1037_s20  ;;  %p1043_p7 = scmp.lt.u32.totalorder %s1037_s20, %s1398_s7 }
 0x213   : > { %p1039_p6 = pnand %p1038_p4, %p974_p5 }
 0x215   : > { %p1040_p8 = pneg %p1039_p6 }
 0x217   : > { %p1045_p2 = pnand %p1043_p7, %p1040_p8 }
 0x219   : > { %1048 = shalt.err (!%p1045_p2)
}
 0x21a   : > { %s1072_s27 = smov 128   ;;  %s1073_s28 = smov 8  }
 0x21b   : > { %965 = dma.vmem_to_hbm [thread:$0]  (%p974_p5), %s809_s16, 256, %s1398_s7, [#allocation4], %s1072_s27, %s1072_s27, %s1073_s28  }
 0x21c   : > { %1058 = dma.done.wait (%p974_p5), [#allocation4], 256  }
 0x21d   : > { %1060 = vsyncadd (%p974_p5), [#allocation4], 4294967040 }
 0x21e PF: > { %s19_s24 = sadd.s32 1, %s1063_s24  }
 0x21f   : > { %p16_p3 = scmp.ge.s32.totalorder %s19_s24, 4  }
 0x221   :  { %18 = sbr.rel (!%p16_p3) target bundleno = 2 (0x2), region = 85 }
 0x228   :  { %824 = vsyncpa [#allocation3], 1 }
 0x229   :  { %826 = vsyncpa [#allocation3 + $0x1], 1 }
 0x22a   :  { %827 = vsyncpa [#allocation4], 1 }
 0x22b   :  { %829 = vsyncpa [#allocation4 + $0x1], 1 }

</bundles_post_ra>
